<compile_context>
chip_gen: v7x
topology: tpu7x:2x2x1
jax: 0.10.0
libtpu: 0.0.40
codegen_flags: <defaults>
</compile_context>

<pallas_src>
import functools

import jax
import jax.numpy as jnp
from jax.experimental import pallas as pl
from jax.experimental.pallas import tpu as pltpu


_VMEM_BUDGET = 16 * 1024 * 1024          # bytes accounted for our buffers
_VMEM_LIMIT = 32 * 1024 * 1024           # scoped VMEM limit passed to Mosaic
_MAX_ROWS = 1024


def _choose_rows_2d(nc, hw, in_itemsize):
    # double-buffered input block + f32 running-max accumulator
    per_row = hw * (2 * in_itemsize + 4)
    rows = max(8, _VMEM_BUDGET // per_row)
    rows = min(rows, _MAX_ROWS)
    if rows >= nc:
        return nc                         # single row tile; block == full dim
    return max(8, (rows // 8) * 8)        # multiple of 8 sublanes


def _choose_rows_3d(nc, hw, d, in_itemsize):
    d_pad = ((d + 7) // 8) * 8            # sublane padding of the D dim
    per_row = hw * d_pad * in_itemsize * 2
    rows = max(8, _VMEM_BUDGET // per_row)
    rows = min(rows, _MAX_ROWS)
    if rows >= nc:
        return nc
    return max(8, (rows // 8) * 8)


def _pool2d_kernel(x_ref, o_ref, acc_ref, *, inv_hw):
    """Grid (row_tiles, D).  x_ref: (ROWS, HW) slab of depth d for this tile."""
    dd = pl.program_id(1)
    x = x_ref[...].astype(jnp.float32)            # in-kernel upcast (native-dtype read)

    @pl.when(dd == 0)
    def _init():
        acc_ref[...] = x

    @pl.when(dd != 0)
    def _update():
        acc_ref[...] = jnp.maximum(acc_ref[...], x)   # running max over D (pure VPU)

    @pl.when(dd == pl.num_programs(1) - 1)
    def _finalize():
        # mean over H*W as sum * (1/HW); inv_hw is a Python constant.
        o_ref[...] = jnp.sum(acc_ref[...], axis=-1, keepdims=True) * inv_hw


def _pool3d_kernel(x_ref, o_ref, *, inv_hw):
    """Fallback (HW not a multiple of 128).  x_ref: (ROWS, D, HW)."""
    x = x_ref[...].astype(jnp.float32)
    m = jnp.max(x, axis=1)                            # max over D
    o_ref[...] = jnp.sum(m, axis=-1, keepdims=True) * inv_hw


def _pool(x):
    """max over D then mean over (H, W):  (N, C, D, H, W) -> (N, C) float32."""
    n, c, d, h, w = x.shape
    nc, hw = n * c, h * w
    inv_hw = 1.0 / float(hw)
    itemsize = jnp.dtype(x.dtype).itemsize

    if hw % 128 == 0:
        rows = _choose_rows_2d(nc, hw, itemsize)
        x2 = x.reshape(nc, d * hw)                    # free reshape (contiguous)
        pooled = pl.pallas_call(
            functools.partial(_pool2d_kernel, inv_hw=inv_hw),
            out_shape=jax.ShapeDtypeStruct((nc, 1), jnp.float32),
            grid=(pl.cdiv(nc, rows), d),              # rows parallel, D = reduction
            in_specs=[pl.BlockSpec((rows, hw), lambda i, dd: (i, dd))],
            out_specs=pl.BlockSpec((rows, 1), lambda i, dd: (i, 0)),
            scratch_shapes=[pltpu.VMEM((rows, hw), jnp.float32)],
            compiler_params=pltpu.CompilerParams(
                dimension_semantics=("parallel", "arbitrary"),
                vmem_limit_bytes=_VMEM_LIMIT),
        )(x2)
    else:
        # TODO(synk): lane-unaligned HW path keeps the full (D, HW) slab per
        # row tile (still row-tiled and pipelined, just sublane-padded on D).
        rows = _choose_rows_3d(nc, hw, d, itemsize)
        x2 = x.reshape(nc, d, hw)
        pooled = pl.pallas_call(
            functools.partial(_pool3d_kernel, inv_hw=inv_hw),
            out_shape=jax.ShapeDtypeStruct((nc, 1), jnp.float32),
            grid=(pl.cdiv(nc, rows),),
            in_specs=[pl.BlockSpec((rows, d, hw), lambda i: (i, 0, 0))],
            out_specs=pl.BlockSpec((rows, 1), lambda i: (i, 0)),
            compiler_params=pltpu.CompilerParams(
                dimension_semantics=("parallel",),
                vmem_limit_bytes=_VMEM_LIMIT),
        )(x2)

    return pooled.reshape(n, c)


def cnn2_5d_decoder_forward(x, weight, bias):
    """Equivalent of CNN2_5d_decoder.forward.

    weight: (n_classes, in_features)  -- nn.Linear convention
    bias:   (n_classes,)
    x: (N, C, D, H, W) array, or tuple/list (x5d, extra_features)
    """
    if isinstance(x, (tuple, list)):
        pooled = _pool(x[0])                                        # (N, C) f32
        feats = jnp.concatenate([pooled, x[1].astype(jnp.float32)], axis=1)
    else:
        feats = _pool(x)                                            # (N, C) f32
    # Tiny (N, F) @ (F, K) + b: left to XLA per perf review -- a dedicated
    # Pallas call costs more in launch/DMA setup than the matmul itself.
    return feats @ weight.T.astype(jnp.float32) + bias.astype(jnp.float32)


if __name__ == "__main__":
    # Small, deterministic example consistent with the module:
    # N=2, C=in_features=4, D=3, H=W=16, n_classes=5
    N, C, D, H, W = 2, 4, 3, 16, 16
    n_classes = 5

    key = jax.random.PRNGKey(0)
    kx, kw, kb, ke, kw2, kb2 = jax.random.split(key, 6)

    x = jax.random.normal(kx, (N, C, D, H, W), dtype=jnp.float32)

    # Deterministic nn.Linear-style init: U(-1/sqrt(F), 1/sqrt(F))
    bound = 1.0 / jnp.sqrt(jnp.float32(C))
    weight = jax.random.uniform(kw, (n_classes, C),
                                minval=-bound, maxval=bound, dtype=jnp.float32)
    bias = jax.random.uniform(kb, (n_classes,),
                              minval=-bound, maxval=bound, dtype=jnp.float32)

    # --- tensor branch, f32 ---
    out = jax.block_until_ready(cnn2_5d_decoder_forward(x, weight, bias))
    ref_pooled = jnp.mean(jnp.max(x, axis=2), axis=(2, 3))          # (N, C)
    ref = ref_pooled @ weight.T + bias
    assert out.shape == (N, n_classes), out.shape
    assert jnp.allclose(out, ref, atol=1e-5, rtol=1e-5)

    # --- tensor branch, native bf16 read (in-kernel upcast) ---
    xb = x.astype(jnp.bfloat16)
    out_b = jax.block_until_ready(cnn2_5d_decoder_forward(xb, weight, bias))
    ref_b = jnp.mean(jnp.max(xb.astype(jnp.float32), axis=2), axis=(2, 3)) @ weight.T + bias
    assert jnp.allclose(out_b, ref_b, atol=1e-4, rtol=1e-4)

    # --- tuple branch: decoder with in_features = C + E ---
    E = 3
    extra = jax.random.normal(ke, (N, E), dtype=jnp.float32)
    bound2 = 1.0 / jnp.sqrt(jnp.float32(C + E))
    weight2 = jax.random.uniform(kw2, (n_classes, C + E),
                                 minval=-bound2, maxval=bound2, dtype=jnp.float32)
    bias2 = jax.random.uniform(kb2, (n_classes,),
                               minval=-bound2, maxval=bound2, dtype=jnp.float32)
    out_t = jax.block_until_ready(
        cnn2_5d_decoder_forward((x, extra), weight2, bias2))
    ref_t = jnp.concatenate([ref_pooled, extra], axis=1) @ weight2.T + bias2
    assert out_t.shape == (N, n_classes)
    assert jnp.allclose(out_t, ref_t, atol=1e-5, rtol=1e-5)

    # --- fallback path: H*W not a multiple of 128 ---
    Hf, Wf = 7, 9
    xf = jax.random.normal(kx, (N, C, D, Hf, Wf), dtype=jnp.float32)
    out_f = jax.block_until_ready(cnn2_5d_decoder_forward(xf, weight, bias))
    ref_f = jnp.mean(jnp.max(xf, axis=2), axis=(2, 3)) @ weight.T + bias
    assert jnp.allclose(out_f, ref_f, atol=1e-5, rtol=1e-5)

    print("KERNEL_OK")
</pallas_src>

<mosaic_0001>
module attributes {stable_mosaic.version = 11 : i64} {
  func.func @_pool2d_kernel(%arg0: i32, %arg1: i32, %arg2: memref<8x256xf32, #tpu.memory_space<vmem>>, %arg3: memref<8x1xf32, #tpu.memory_space<vmem>>, %arg4: memref<8x256xf32, #tpu.memory_space<vmem>>) attributes {dimension_semantics = [#tpu.dimension_semantics<parallel>, #tpu.dimension_semantics<arbitrary>], iteration_bounds = array<i64: 1, 3>, scalar_prefetch = 0 : i64, scratch_operands = 1 : i64, tpu.core_type = #tpu.core_type<tc>, window_params = [{transform_indices = @transform_0, window_bounds = array<i64: 8, 256>}, {transform_indices = @transform_1, window_bounds = array<i64: 8, 1>}]} {
    %c0 = arith.constant 0 : index
    %c0_0 = arith.constant 0 : index
    %0 = vector.load %arg2[%c0, %c0_0] : memref<8x256xf32, #tpu.memory_space<vmem>>, vector<8x256xf32>
    %c0_i32 = arith.constant 0 : i32
    %1 = arith.cmpi eq, %arg1, %c0_i32 : i32
    %2 = arith.extui %1 : i1 to i32
    %c0_i32_1 = arith.constant 0 : i32
    %3 = arith.cmpi ne, %2, %c0_i32_1 : i32
    scf.if %3 {
      %c0_5 = arith.constant 0 : index
      %c0_6 = arith.constant 0 : index
      %10 = vector.load %arg4[%c0_5, %c0_6] : memref<8x256xf32, #tpu.memory_space<vmem>>, vector<8x256xf32>
      tpu.vector_store %arg4[%c0_5, %c0_6], %0 {strides = array<i32>} : memref<8x256xf32, #tpu.memory_space<vmem>>, vector<8x256xf32>,
    } else {
    }
    %c0_i32_2 = arith.constant 0 : i32
    %4 = arith.cmpi ne, %arg1, %c0_i32_2 : i32
    %5 = arith.extui %4 : i1 to i32
    %c0_i32_3 = arith.constant 0 : i32
    %6 = arith.cmpi ne, %5, %c0_i32_3 : i32
    scf.if %6 {
      %c0_5 = arith.constant 0 : index
      %c0_6 = arith.constant 0 : index
      %10 = vector.load %arg4[%c0_5, %c0_6] : memref<8x256xf32, #tpu.memory_space<vmem>>, vector<8x256xf32>
      %11 = arith.maximumf %10, %0 : vector<8x256xf32>
      %c0_7 = arith.constant 0 : index
      %c0_8 = arith.constant 0 : index
      %12 = vector.load %arg4[%c0_7, %c0_8] : memref<8x256xf32, #tpu.memory_space<vmem>>, vector<8x256xf32>
      tpu.vector_store %arg4[%c0_7, %c0_8], %11 {strides = array<i32>} : memref<8x256xf32, #tpu.memory_space<vmem>>, vector<8x256xf32>,
    } else {
    }
    %c2_i32 = arith.constant 2 : i32
    %7 = arith.cmpi eq, %arg1, %c2_i32 : i32
    %8 = arith.extui %7 : i1 to i32
    %c0_i32_4 = arith.constant 0 : i32
    %9 = arith.cmpi ne, %8, %c0_i32_4 : i32
    scf.if %9 {
      %c0_5 = arith.constant 0 : index
      %c0_6 = arith.constant 0 : index
      %10 = vector.load %arg4[%c0_5, %c0_6] : memref<8x256xf32, #tpu.memory_space<vmem>>, vector<8x256xf32>
      %cst = arith.constant dense<0.000000e+00> : vector<8xf32>
      %11 = vector.multi_reduction <add>, %10, %cst [1] : vector<8x256xf32> to vector<8xf32>
      %12 = vector.shape_cast %11 : vector<8xf32> to vector<8x1xf32>
      %cst_7 = arith.constant 3.906250e-03 : f32
      %13 = vector.broadcast %cst_7 : f32 to vector<8x1xf32>
      %14 = arith.mulf %12, %13 : vector<8x1xf32>
      %c0_8 = arith.constant 0 : index
      %c0_9 = arith.constant 0 : index
      %15 = vector.load %arg3[%c0_8, %c0_9] : memref<8x1xf32, #tpu.memory_space<vmem>>, vector<8x1xf32>
      tpu.vector_store %arg3[%c0_8, %c0_9], %14 {strides = array<i32>} : memref<8x1xf32, #tpu.memory_space<vmem>>, vector<8x1xf32>,
    } else {
    }
    return
  }
  func.func @transform_0(%arg0: i32, %arg1: i32) -> (i32, i32) {
    %c0_i32 = arith.constant 0 : i32
    return %arg0, %arg1 : i32, i32
  }
  func.func @transform_1(%arg0: i32, %arg1: i32) -> (i32, i32) {
    %c0_i32 = arith.constant 0 : i32
    %c0_i32_0 = arith.constant 0 : i32
    return %arg0, %c0_i32 : i32, i32
  }
}

</mosaic_0001>

<bundles_post_ra>
// kernel: tpu_custom_call.1
= control target key start
LH: loop header
LB: loop body
LE: loop exit
PB: predicated region body
PF: predicated region fallthrough
CT: control target
= control target key end

     0   :  { %6 = vsyncpa [#allocation4], 0  ;;  %s542_s0 = inlined_call_operand.hbm [shape: f32[8,768], index: 0, kind: input, shape index: {}]   ;;  %s543_s1 = inlined_call_operand.vmem [shape: f32[8,1], index: 1, kind: output, shape index: {}]  }
   0x1   :  { %8 = vsyncpa [#allocation4 + $0x1], 0  ;;  %s416_s6 = smov 0   ;;  %s418_s7 = smov 0  }
   0x2   :  { %s420_s8 = smov 0   ;;  %s422_s9 = smov 0  }
   0x3   :  { %s424_s10 = smov 0   ;;  %s426_s11 = smov 0  }
   0x4 LB: > { %s253_s12 = sadd.s32 4294967295, %s403_s11   ;;  %s23_s13 = sadd.s32 1, %s399_s10  ;;  %s403_s11 = sphi %s426_s11, %s14_s11   ;;  %s399_s10 = sphi %s424_s10, %s553_s10   ;;  %s395_s9 = sphi %s422_s9, %s552_s9   ;;  %s391_s8 = sphi %s420_s8, %s551_s8   ;;  %s387_s7 = sphi %s418_s7, %s550_s7   ;;  %s383_s6 = sphi %s416_s6, %s549_s6  }
   0x5   : > { %p24_p0 = scmp.ge.s32.totalorder %s23_s13, 3  ;;  %s35_s14 = sadd.s32 1, %s391_s8 }
   0x6   : > { %p42_p1 = scmp.ne.s32.totalorder %s391_s8, %s387_s7  ;;  %p43_p2 = scmp.eq.s32.totalorder %s403_s11, 0 }
   0x7   : > { %s555_s13 = smov (%p24_p0, %s23_s13), 0  ;;  %p48_p4 = scmp.ne.s32.totalorder %s387_s7, %s383_s6 }
   0x8   : > { %p452_p3 = por %p43_p2, %p42_p1  ;;  %s31_s16 = ssub.s32 %s399_s10, %s555_s13 }
   0x9   : > { %p49_p5 = scmp.eq.s32.totalorder %s253_s12, 0  ;;  %p33_p6 = scmp.eq.s32.totalorder %s31_s16, 0 }
   0xa   : > { %p274_p8 = scmp.lt.s32.totalorder %s403_s11, 3  ;;  %s98_s19 = sand.u32 1, %s391_s8  }
   0xb   : > { %p459_p7 = por %p49_p5, %p48_p4  ;;  %s267_s20 = sshll.u32 %s399_s10, 8 }
   0xc   : > { %s465_s18 = scalar_select %p33_p6, %s391_s8, %s35_s14  }
   0xd   : > { %s256_s21 = sshll.u32 %s98_s19, 4  ;;  %s472_s24 = scalar_lea.hbm %s542_s0, %s267_s20 }
   0xe   : > { %s102_s25 = scalar_lea.vmem [#allocation3], %s256_s21  ;;  %p476_p9 = pnand %p274_p8, %p452_p3 }
   0xf   : > { %s112_s26 = sshll.u32 %s102_s25, 4  ;;  %s99_s28 = scalar_lea.sflag [#allocation4], %s98_s19  ;;  %s480_s26 = int_to_ptr.vmem [resolvable:$true] %s112_s26 }
  0x10   : > { %s323_s29 = scalar_lea.hbm %s472_s24, 256  ;;  %p325_p13 = pneg %p476_p9 }
  0x11   : > { %p324_p12 = scmp.ne.s32.totalorder %s472_s24, %s323_s29  ;;  %s328_s3 = scalar_lea.hbm %s542_s0, 768 }
  0x12   : > { %p329_p2 = scmp.lt.u32.totalorder %s472_s24, %s542_s0  ;;  %p330_p3 = scmp.lt.u32.totalorder %s328_s3, %s323_s29 }
  0x13   : > { %p326_p0 = pnand %p325_p13, %p324_p12  ;;  %p332_p5 = scmp.lt.u32.totalorder %s323_s29, %s472_s24 }
  0x14   : > { %p331_p4 = por %p330_p3, %p329_p2 }
  0x15   : > { %p327_p1 = pneg %p326_p0 }
  0x16   : > { %p333_p6 = por %p332_p5, %p331_p4 }
  0x18   : > { %p334_p8 = pnand %p333_p6, %p327_p1 }
  0x1a   : > { %337 = shalt.err (!%p334_p8)
}
  0x1b   : > { %s338_s6 = scalar_lea.vmem %s480_s26, 256  ;;  %s405_s12 = smov [#allocation3]  }
  0x1c   : > { %p339_p12 = scmp.ne.s32.totalorder %s480_s26, %s338_s6  ;;  %s343_s14 = sshll.u32 %s405_s12, 4  ;;  %s344_s14 = int_to_ptr.vmem [resolvable:$false] %s343_s14 }
  0x1d   : > { %s345_s15 = scalar_lea.vmem %s344_s14, 512  ;;  %p346_p11 = scmp.lt.s32.totalorder %s480_s26, %s344_s14 }
  0x1e   : > { %p341_p0 = pnand %p339_p12, %p325_p13  ;;  %p347_p2 = scmp.lt.s32.totalorder %s345_s15, %s338_s6 }
  0x20   : > { %p342_p10 = pneg %p341_p0  ;;  %p348_p3 = por %p347_p2, %p346_p11 }
  0x22   : > { %p349_p4 = pnand %p348_p3, %p342_p10 }
  0x24   : > { %352 = shalt.err (!%p349_p4)
}
  0x25   : > { %273 = dma.hbm_to_vmem [thread:$0]  (!%p476_p9), %s472_s24, 256, %s480_s26, %s99_s28  }
  0x26   : > { %p547_p1 = scmp.lt.s32.totalorder %s403_s11, 4  ;;  %p548_p5 = scmp.ge.s32.totalorder %s403_s11, 1 }
  0x28   : > { %p118_p13 = pnand %p548_p5, %p547_p1 }
  0x29   : > { %s123_s16 = sand.u32 (!%p118_p13), 1, %s387_s7  }
  0x2a   : > { %121 = sbr.rel (%p118_p13) target bundleno = 218 (0xda), region = 24  ;;  %s260_s19 = sshll.u32 (!%p118_p13), %s123_s16, 4 }
  0x2b   : > { %s124_s20 = scalar_lea.sflag (!%p118_p13), [#allocation4], %s123_s16  ;;  %s127_s21 = scalar_lea.vmem (!%p118_p13), [#allocation3], %s260_s19 }
  0x31   : > { %378 = dma.done.wait (%p459_p7), %s124_s20, 256  }
  0x32   : > { %380 = vsyncadd (%p459_p7), %s124_s20, 4294967040  ;;  %v150_v0 = vld [vmem:[%s127_s21] sm:$0xff]  ;;  %v151_v1 = vld [vmem:[%s127_s21 + $0x8] sm:$0xff]  ;;  %p261_p10 = scmp.ne.s32.totalorder %s395_s9, 0 }
  0x33   : > { %156 = vst [vmem:[#allocation2] sm:$0xff] (!%p261_p10), %v150_v0  ;;  %157 = vst [vmem:[#allocation2 + $0x8] sm:$0xff] (!%p261_p10), %v151_v1 }
  0x34   : > { %155 = sbr.rel (%p261_p10) target bundleno = 59 (0x3b), region = 32 }
  0x3b PF: > { %p262_p9 = scmp.eq.s32.totalorder %s395_s9, 0 }
  0x3c   : > { %v162_v2 = vld [vmem:[#allocation2] sm:$0xff] (!%p262_p9)  ;;  %v163_v3 = vld [vmem:[#allocation2 + $0x8] sm:$0xff] (!%p262_p9) }
  0x3d   : > { %161 = sbr.rel (%p262_p9) target bundleno = 68 (0x44), region = 36  ;;  %v164_v4 = vmax.f32 (!%p262_p9), %v162_v2, %v150_v0  ;;  %v165_v5 = vmax.f32 (!%p262_p9), %v163_v3, %v151_v1 }
  0x3f   : > { %166 = vst [vmem:[#allocation2] sm:$0xff] (!%p262_p9), %v164_v4  ;;  %167 = vst [vmem:[#allocation2 + $0x8] sm:$0xff] (!%p262_p9), %v165_v5 }
  0x44 PF: > { %p263_p7 = scmp.ne.s32.totalorder %s395_s9, 2 }
  0x45   : > { %vm178_vm0 = vcmask (!%p263_p7), 7168  }
  0x46   : > { %171 = sbr.rel (%p263_p7) target bundleno = 218 (0xda), region = 40  ;;  %v172_v6 = vld [vmem:[#allocation2] sm:$0xff] (!%p263_p7)  ;;  %v173_v7 = vld [vmem:[#allocation2 + $0x8] sm:$0xff] (!%p263_p7) }
  0x47   : > { %v174_v8 = vadd.f32 (!%p263_p7), %v173_v7, %v172_v6 }
  0x49   : > { %175 = vadd.xlane.f32.xlu0 (!%p263_p7), %v174_v8 }
  0xd6   : > { %v176_v9 = vpop.xlane.xlu0 %175 }
  0xd7   : > { %v177_v10 = vmul.f32 0.00390625, %v176_v9 }
  0xd9   : > { %179 = vst.msk [vmem:[%s543_s1] sm:$0xff] %vm178_vm0, %v177_v10 }
  0xda PF: > { %s14_s11 = sadd.s32 1, %s403_s11   ;;  %s549_s6 = smov %s387_s7 }
  0xdb   : > { %p11_p11 = scmp.ge.s32.totalorder %s14_s11, 5   ;;  %s550_s7 = smov %s391_s8 }
  0xdc   : > { %s551_s8 = smov %s465_s18  ;;  %s552_s9 = smov %s399_s10 }
  0xdd   : > { %s553_s10 = smov %s555_s13  ;;  %13 = sbr.rel (!%p11_p11) target bundleno = 4 (0x4), region = 76 }
  0xe4   :  { %199 = vsyncpa [#allocation4], 1 }
  0xe5   :  { %201 = vsyncpa [#allocation4 + $0x1], 1 }

</bundles_post_ra>
